<compile_context>
chip_gen: v7x
topology: tpu7x:2x2x1
jax: 0.10.0
libtpu: 0.0.40
codegen_flags: <defaults>
</compile_context>

<pallas_src>
import jax
import jax.numpy as jnp
from jax.experimental import pallas as pl
from jax.experimental.pallas import tpu as pltpu

_MIB = 1024 * 1024


# --------------------------------------------------------------------------
# VMEM budgeting / batch tiling
# --------------------------------------------------------------------------
def _vmem_capacity_bytes():
    try:
        info = pltpu.get_tpu_info()
        cap = getattr(info, "vmem_capacity_bytes", None)
        if cap:
            return int(cap)
    except Exception:
        pass
    return 64 * _MIB  # conservative fallback: v7x per-TensorCore VMEM


def _round_up(x, m):
    return (x + m - 1) // m * m


def _per_row_vmem_bytes(N, D, H):
    # Rough per-batch-row working set:
    stream = 2 * (N * D + 2 * D) * 4        # depth-2 pipelined preds/inputs/targets (f32)
    matmul = N * (D * 6 + H * 4)            # f32 preds load + bf16 copy + f32 hidden acts
    misc = 4 * D + 256                      # preds_rm / scores / probs temps
    return stream + matmul + misc


def _pick_batch_tile(B, N, D, H):
    """Returns (TB, B_pad, nb): batch tile, padded batch, number of tiles."""
    budget = _vmem_capacity_bytes() // 5    # keep depth-2 pipelining + headroom
    cap = budget // _per_row_vmem_bytes(N, D, H)
    cap = max(128, min(1024, (cap // 128) * 128))  # lane-aligned tiles
    if B <= cap:
        B_pad = _round_up(B, 8)             # sublane-aligned single tile
        return B_pad, B_pad, 1
    TB = cap
    B_pad = _round_up(B, TB)
    return TB, B_pad, B_pad // TB


def _vmem_limit_bytes(TB, N, D, H):
    weights = 2 * D * H * 2 + 2 * H * 4
    est = TB * _per_row_vmem_bytes(N, D, H) + weights + 4 * _MIB
    return int(min(48 * _MIB, max(2 * est, 32 * _MIB)))


def _pad_rows(x, B_pad):
    B = x.shape[0]
    if B_pad == B:
        return x
    return jnp.pad(x, [(0, B_pad - B)] + [(0, 0)] * (x.ndim - 1))


# --------------------------------------------------------------------------
# Shared selector math (runs on a (TB, N, D) batch tile)
# --------------------------------------------------------------------------
def _selector_compute(preds_ref, inp_ref, w1p_ref, w1x_ref, b1_ref, w2_ref):
    TB, N, D = preds_ref.shape
    H = w1p_ref.shape[1]
    preds = preds_ref[...]                                            # (TB, N, D) f32

    # Split hidden layer: h = relu(preds @ W1p + x @ W1x + b1).
    h_p = jnp.dot(preds.reshape(TB * N, D).astype(jnp.bfloat16), w1p_ref[...],
                  preferred_element_type=jnp.float32)                 # (TB*N, H)
    h_x = jnp.dot(inp_ref[...].astype(jnp.bfloat16), w1x_ref[...],
                  preferred_element_type=jnp.float32)                 # (TB, H)
    h = jnp.maximum(h_p.reshape(TB, N, H) + h_x[:, None, :] + b1_ref[...], 0.0)

    # Candidate scores: VPU multiply + lane reduction (w2 is lane-major (1, H)).
    scores = jnp.sum(h * w2_ref[...], axis=-1, keepdims=True)         # (TB, N, 1)

    # Stable softmax over the candidate (sublane) axis; approx reciprocal -> EUP.
    m = jnp.max(scores, axis=1, keepdims=True)
    e = jnp.exp(scores - m)
    probs = e * pl.reciprocal(jnp.sum(e, axis=1, keepdims=True), approx=True)

    # Selection-weighted prediction.
    return jnp.sum(probs * preds, axis=1)                             # (TB, D) f32


# --------------------------------------------------------------------------
# Kernels (selector + criterion fused; one pallas_call per mode)
# --------------------------------------------------------------------------
def _train_kernel(preds_ref, inp_ref, tgt_ref, w1p_ref, w1x_ref, b1_ref, w2_ref,
                  part_ref):
    preds_rm = _selector_compute(preds_ref, inp_ref, w1p_ref, w1x_ref, b1_ref, w2_ref)
    d = preds_rm - tgt_ref[...]
    # Lane-dense per-tile partial SSE; final tiny reduction happens in JAX.
    part_ref[...] = jnp.sum(d * d, axis=0, keepdims=True)             # (1, D)


def _test_kernel(preds_ref, inp_ref, tgt_ref, w1p_ref, w1x_ref, b1_ref, w2_ref,
                 rm_ref, err_ref):
    preds_rm = _selector_compute(preds_ref, inp_ref, w1p_ref, w1x_ref, b1_ref, w2_ref)
    rm_ref[...] = preds_rm.astype(rm_ref.dtype)
    d = preds_rm - tgt_ref[...]
    err_ref[...] = jnp.sum(d * d, axis=-1)[None, :]                   # (1, TB) lane-dense


def _selector_kernel(preds_ref, inp_ref, w1p_ref, w1x_ref, b1_ref, w2_ref, rm_ref):
    rm_ref[...] = _selector_compute(
        preds_ref, inp_ref, w1p_ref, w1x_ref, b1_ref, w2_ref).astype(rm_ref.dtype)


# --------------------------------------------------------------------------
# BlockSpec builders
# --------------------------------------------------------------------------
def _stream_specs(TB, N, D, with_targets):
    specs = [
        pl.BlockSpec((TB, N, D), lambda b: (b, 0, 0)),   # preds tile (dominant stream)
        pl.BlockSpec((TB, D), lambda b: (b, 0)),         # inputs tile
    ]
    if with_targets:
        specs.append(pl.BlockSpec((TB, D), lambda b: (b, 0)))  # targets tile
    return specs


def _weight_specs(D, H):
    return [
        pl.BlockSpec((D, H), lambda b: (0, 0)),          # W1p (bf16, resident)
        pl.BlockSpec((D, H), lambda b: (0, 0)),          # W1x (bf16, resident)
        pl.BlockSpec((1, H), lambda b: (0, 0)),          # b1
        pl.BlockSpec((1, H), lambda b: (0, 0)),          # w2 (lane-major)
    ]


# --------------------------------------------------------------------------
# pallas_call wrappers
# --------------------------------------------------------------------------
def selecting_model_train(preds, inputs, targets, w1p, w1x, b1, w2):
    B, N, D = preds.shape
    H = w1p.shape[1]
    TB, B_pad, nb = _pick_batch_tile(B, N, D, H)
    preds_p = _pad_rows(preds, B_pad)
    inputs_p = _pad_rows(inputs, B_pad)
    targets_p = _pad_rows(targets, B_pad)   # zero-padded rows contribute 0 to SSE
    partials = pl.pallas_call(
        _train_kernel,
        out_shape=jax.ShapeDtypeStruct((nb, D), jnp.float32),
        grid_spec=pltpu.PrefetchScalarGridSpec(
            num_scalar_prefetch=0,
            grid=(nb,),
            in_specs=_stream_specs(TB, N, D, True) + _weight_specs(D, H),
            out_specs=pl.BlockSpec((1, D), lambda b: (b, 0)),
        ),
        compiler_params=pltpu.CompilerParams(
            dimension_semantics=("parallel",),           # batch tiles independent
            vmem_limit_bytes=_vmem_limit_bytes(TB, N, D, H)),
    )(preds_p, inputs_p, targets_p, w1p, w1x, b1, w2)
    # MSE over the real (unpadded) batch; final reduction is tiny and f32-exact.
    return jnp.sum(partials) * (1.0 / float(B * D))


def selecting_model_test(preds, inputs, targets, w1p, w1x, b1, w2):
    B, N, D = preds.shape
    H = w1p.shape[1]
    TB, B_pad, nb = _pick_batch_tile(B, N, D, H)
    preds_p = _pad_rows(preds, B_pad)
    inputs_p = _pad_rows(inputs, B_pad)
    targets_p = _pad_rows(targets, B_pad)
    preds_rm, err = pl.pallas_call(
        _test_kernel,
        out_shape=(
            jax.ShapeDtypeStruct((B_pad, D), jnp.float32),
            jax.ShapeDtypeStruct((nb, TB), jnp.float32),
        ),
        grid_spec=pltpu.PrefetchScalarGridSpec(
            num_scalar_prefetch=0,
            grid=(nb,),
            in_specs=_stream_specs(TB, N, D, True) + _weight_specs(D, H),
            out_specs=[
                pl.BlockSpec((TB, D), lambda b: (b, 0)),
                pl.BlockSpec((1, TB), lambda b: (b, 0)),   # lane-dense error blocks
            ],
        ),
        compiler_params=pltpu.CompilerParams(
            dimension_semantics=("parallel",),
            vmem_limit_bytes=_vmem_limit_bytes(TB, N, D, H)),
    )(preds_p, inputs_p, targets_p, w1p, w1x, b1, w2)
    return {"preds_rm": preds_rm[:B],
            "per_sample_error": err.reshape(B_pad)[:B]}


def selecting_model_selector(preds, inputs, w1p, w1x, b1, w2):
    # Selector-only path: no targets stream, no error math.
    B, N, D = preds.shape
    H = w1p.shape[1]
    TB, B_pad, nb = _pick_batch_tile(B, N, D, H)
    preds_p = _pad_rows(preds, B_pad)
    inputs_p = _pad_rows(inputs, B_pad)
    preds_rm = pl.pallas_call(
        _selector_kernel,
        out_shape=jax.ShapeDtypeStruct((B_pad, D), jnp.float32),
        grid_spec=pltpu.PrefetchScalarGridSpec(
            num_scalar_prefetch=0,
            grid=(nb,),
            in_specs=_stream_specs(TB, N, D, False) + _weight_specs(D, H),
            out_specs=pl.BlockSpec((TB, D), lambda b: (b, 0)),
        ),
        compiler_params=pltpu.CompilerParams(
            dimension_semantics=("parallel",),
            vmem_limit_bytes=_vmem_limit_bytes(TB, N, D, H)),
    )(preds_p, inputs_p, w1p, w1x, b1, w2)
    return preds_rm[:B]


# --------------------------------------------------------------------------
# SelectingModel wrapper (mirrors the PyTorch module's forward dispatch)
# --------------------------------------------------------------------------
class SelectingModelPallas:
    mode_list = ["train-rm", "test"]

    def __init__(self, n_cand=8, dim=128, hidden=128, seed=42):
        assert dim % 128 == 0 and hidden % 128 == 0 and n_cand % 8 == 0
        key = jax.random.PRNGKey(seed)
        k1, k2, k3, k4 = jax.random.split(key, 4)
        scale = 1.0 / jnp.sqrt(dim)
        # Split hidden weights (bf16 halves weight DMA; MXU accumulates in f32).
        self.w1p = (jax.random.normal(k1, (dim, hidden), jnp.float32) * scale
                    ).astype(jnp.bfloat16)
        self.w1x = (jax.random.normal(k2, (dim, hidden), jnp.float32) * scale
                    ).astype(jnp.bfloat16)
        self.b1 = jax.random.normal(k3, (1, hidden), jnp.float32) * 0.01
        # Lane-major score vector so scoring is a VPU mul + lane reduction.
        self.w2 = jax.random.normal(k4, (1, hidden), jnp.float32) * (1.0 / jnp.sqrt(hidden))

    def selector(self, preds, inputs):
        return selecting_model_selector(preds, inputs,
                                        self.w1p, self.w1x, self.b1, self.w2)

    def forward(self, preds, inputs, targets, meta_info, mode=None):
        # TODO(synk): meta_info is opaque in the reference module (consumed by the
        # dynamically-imported selector/criterion); it is accepted but unused here.
        if mode == "train-rm":
            return selecting_model_train(preds, inputs, targets,
                                         self.w1p, self.w1x, self.b1, self.w2)
        elif mode == "test":
            return selecting_model_test(preds, inputs, targets,
                                        self.w1p, self.w1x, self.b1, self.w2)
        else:
            raise KeyError(
                f"arg `mode` should be one of {self.mode_list} but got {mode} !")

    __call__ = forward


if __name__ == "__main__":
    B, N, D, H = 8, 8, 128, 128  # batch, candidates, feature dim, hidden dim

    key = jax.random.PRNGKey(0)
    kp, ki, kt = jax.random.split(key, 3)
    preds = jax.random.normal(kp, (B, N, D), jnp.float32)
    inputs = jax.random.normal(ki, (B, D), jnp.float32)
    targets = jax.random.normal(kt, (B, D), jnp.float32)
    meta_info = None

    model = SelectingModelPallas(n_cand=N, dim=D, hidden=H)

    loss = model(preds, inputs, targets, meta_info, mode="train-rm")
    jax.block_until_ready(loss)

    res = model(preds, inputs, targets, meta_info, mode="test")
    jax.block_until_ready(res["preds_rm"])
    jax.block_until_ready(res["per_sample_error"])

    sel = model.selector(preds, inputs)
    jax.block_until_ready(sel)

    print("KERNEL_OK")
</pallas_src>

<mosaic_0001>
module attributes {stable_mosaic.version = 11 : i64} {
  func.func @_train_kernel(%arg0: i32, %arg1: memref<8x8x128xf32, #tpu.memory_space<vmem>>, %arg2: memref<8x128xf32, #tpu.memory_space<vmem>>, %arg3: memref<8x128xf32, #tpu.memory_space<vmem>>, %arg4: memref<128x128xbf16, #tpu.memory_space<vmem>>, %arg5: memref<128x128xbf16, #tpu.memory_space<vmem>>, %arg6: memref<1x128xf32, #tpu.memory_space<vmem>>, %arg7: memref<1x128xf32, #tpu.memory_space<vmem>>, %arg8: memref<1x128xf32, #tpu.memory_space<vmem>>) attributes {dimension_semantics = [#tpu.dimension_semantics<parallel>], iteration_bounds = array<i64: 1>, scalar_prefetch = 0 : i64, scratch_operands = 0 : i64, tpu.core_type = #tpu.core_type<tc>, window_params = [{transform_indices = @transform_0, window_bounds = array<i64: 8, 8, 128>}, {transform_indices = @transform_1, window_bounds = array<i64: 8, 128>}, {transform_indices = @transform_2, window_bounds = array<i64: 8, 128>}, {pipeline_mode = #tpu.pipeline_mode<synchronous>, transform_indices = @transform_3, window_bounds = array<i64: 128, 128>}, {pipeline_mode = #tpu.pipeline_mode<synchronous>, transform_indices = @transform_4, window_bounds = array<i64: 128, 128>}, {pipeline_mode = #tpu.pipeline_mode<synchronous>, transform_indices = @transform_5, window_bounds = array<i64: 1, 128>}, {pipeline_mode = #tpu.pipeline_mode<synchronous>, transform_indices = @transform_6, window_bounds = array<i64: 1, 128>}, {transform_indices = @transform_7, window_bounds = array<i64: 1, 128>}]} {
    %c0 = arith.constant 0 : index
    %c0_0 = arith.constant 0 : index
    %c0_1 = arith.constant 0 : index
    %0 = vector.load %arg1[%c0, %c0_0, %c0_1] : memref<8x8x128xf32, #tpu.memory_space<vmem>>, vector<8x8x128xf32>
    %1 = vector.shape_cast %0 : vector<8x8x128xf32> to vector<64x128xf32>
    %2 = arith.truncf %1 : vector<64x128xf32> to vector<64x128xbf16>
    %c0_2 = arith.constant 0 : index
    %c0_3 = arith.constant 0 : index
    %3 = vector.load %arg4[%c0_2, %c0_3] : memref<128x128xbf16, #tpu.memory_space<vmem>>, vector<128x128xbf16>
    %cst = arith.constant dense<0.000000e+00> : vector<64x128xf32>
    %4 = tpu.matmul %2, %3, %cst {dimension_numbers = #tpu.dot_dimension_numbers<[1], [0], [0], [1], [0, 0, 1, 1], [], []>} : vector<64x128xbf16>, vector<128x128xbf16>, vector<64x128xf32> -> vector<64x128xf32>
    %c0_4 = arith.constant 0 : index
    %c0_5 = arith.constant 0 : index
    %5 = vector.load %arg2[%c0_4, %c0_5] : memref<8x128xf32, #tpu.memory_space<vmem>>, vector<8x128xf32>
    %6 = arith.truncf %5 : vector<8x128xf32> to vector<8x128xbf16>
    %c0_6 = arith.constant 0 : index
    %c0_7 = arith.constant 0 : index
    %7 = vector.load %arg5[%c0_6, %c0_7] : memref<128x128xbf16, #tpu.memory_space<vmem>>, vector<128x128xbf16>
    %cst_8 = arith.constant dense<0.000000e+00> : vector<8x128xf32>
    %8 = tpu.matmul %6, %7, %cst_8 {dimension_numbers = #tpu.dot_dimension_numbers<[1], [0], [0], [1], [0, 0, 1, 1], [], []>} : vector<8x128xbf16>, vector<128x128xbf16>, vector<8x128xf32> -> vector<8x128xf32>
    %9 = vector.shape_cast %4 : vector<64x128xf32> to vector<8x8x128xf32>
    %10 = vector.shape_cast %8 : vector<8x128xf32> to vector<8x1x128xf32>
    %11 = vector.broadcast %10 : vector<8x1x128xf32> to vector<8x8x128xf32>
    %12 = arith.addf %9, %11 : vector<8x8x128xf32>
    %c0_9 = arith.constant 0 : index
    %c0_10 = arith.constant 0 : index
    %13 = vector.load %arg6[%c0_9, %c0_10] : memref<1x128xf32, #tpu.memory_space<vmem>>, vector<1x128xf32>
    %14 = vector.shape_cast %13 : vector<1x128xf32> to vector<1x1x128xf32>
    %15 = vector.broadcast %14 : vector<1x1x128xf32> to vector<8x8x128xf32>
    %16 = arith.addf %12, %15 : vector<8x8x128xf32>
    %cst_11 = arith.constant 0.000000e+00 : f32
    %17 = vector.broadcast %cst_11 : f32 to vector<8x8x128xf32>
    %18 = arith.maximumf %16, %17 : vector<8x8x128xf32>
    %c0_12 = arith.constant 0 : index
    %c0_13 = arith.constant 0 : index
    %19 = vector.load %arg7[%c0_12, %c0_13] : memref<1x128xf32, #tpu.memory_space<vmem>>, vector<1x128xf32>
    %20 = vector.shape_cast %19 : vector<1x128xf32> to vector<1x1x128xf32>
    %21 = vector.broadcast %20 : vector<1x1x128xf32> to vector<8x8x128xf32>
    %22 = arith.mulf %18, %21 : vector<8x8x128xf32>
    %cst_14 = arith.constant dense<0.000000e+00> : vector<8x8xf32>
    %23 = vector.multi_reduction <add>, %22, %cst_14 [2] : vector<8x8x128xf32> to vector<8x8xf32>
    %24 = vector.shape_cast %23 : vector<8x8xf32> to vector<8x8x1xf32>
    %cst_15 = arith.constant dense<0xFF800000> : vector<8x1xf32>
    %25 = vector.multi_reduction <maximumf>, %24, %cst_15 [1] : vector<8x8x1xf32> to vector<8x1xf32>
    %26 = vector.shape_cast %25 : vector<8x1xf32> to vector<8x1x1xf32>
    %27 = vector.broadcast %26 : vector<8x1x1xf32> to vector<8x8x1xf32>
    %28 = arith.subf %24, %27 : vector<8x8x1xf32>
    %29 = math.exp %28 : vector<8x8x1xf32>
    %cst_16 = arith.constant dense<0.000000e+00> : vector<8x1xf32>
    %30 = vector.multi_reduction <add>, %29, %cst_16 [1] : vector<8x8x1xf32> to vector<8x1xf32>
    %31 = vector.shape_cast %30 : vector<8x1xf32> to vector<8x1x1xf32>
    %32 = tpu.reciprocal %31 {approx = true} : vector<8x1x1xf32> -> vector<8x1x1xf32>
    %33 = vector.broadcast %32 : vector<8x1x1xf32> to vector<8x8x1xf32>
    %34 = arith.mulf %29, %33 : vector<8x8x1xf32>
    %35 = vector.broadcast %34 : vector<8x8x1xf32> to vector<8x8x128xf32>
    %36 = arith.mulf %35, %0 : vector<8x8x128xf32>
    %cst_17 = arith.constant dense<0.000000e+00> : vector<8x128xf32>
    %37 = vector.multi_reduction <add>, %36, %cst_17 [1] : vector<8x8x128xf32> to vector<8x128xf32>
    %c0_18 = arith.constant 0 : index
    %c0_19 = arith.constant 0 : index
    %38 = vector.load %arg3[%c0_18, %c0_19] : memref<8x128xf32, #tpu.memory_space<vmem>>, vector<8x128xf32>
    %39 = arith.subf %37, %38 : vector<8x128xf32>
    %40 = arith.mulf %39, %39 : vector<8x128xf32>
    %cst_20 = arith.constant dense<0.000000e+00> : vector<128xf32>
    %41 = vector.multi_reduction <add>, %40, %cst_20 [0] : vector<8x128xf32> to vector<128xf32>
    %42 = vector.shape_cast %41 : vector<128xf32> to vector<1x128xf32>
    %c0_21 = arith.constant 0 : index
    %c0_22 = arith.constant 0 : index
    %43 = vector.load %arg8[%c0_21, %c0_22] : memref<1x128xf32, #tpu.memory_space<vmem>>, vector<1x128xf32>
    tpu.vector_store %arg8[%c0_21, %c0_22], %42 {strides = array<i32>} : memref<1x128xf32, #tpu.memory_space<vmem>>, vector<1x128xf32>,
    return
  }
  func.func @transform_0(%arg0: i32) -> (i32, i32, i32) {
    %c0_i32 = arith.constant 0 : i32
    %c0_i32_0 = arith.constant 0 : i32
    %c0_i32_1 = arith.constant 0 : i32
    return %arg0, %c0_i32, %c0_i32_0 : i32, i32, i32
  }
  func.func @transform_1(%arg0: i32) -> (i32, i32) {
    %c0_i32 = arith.constant 0 : i32
    %c0_i32_0 = arith.constant 0 : i32
    return %arg0, %c0_i32 : i32, i32
  }
  func.func @transform_2(%arg0: i32) -> (i32, i32) {
    %c0_i32 = arith.constant 0 : i32
    %c0_i32_0 = arith.constant 0 : i32
    return %arg0, %c0_i32 : i32, i32
  }
  func.func @transform_3(%arg0: i32) -> (i32, i32) {
    %c0_i32 = arith.constant 0 : i32
    %c0_i32_0 = arith.constant 0 : i32
    %c0_i32_1 = arith.constant 0 : i32
    return %c0_i32, %c0_i32_0 : i32, i32
  }
  func.func @transform_4(%arg0: i32) -> (i32, i32) {
    %c0_i32 = arith.constant 0 : i32
    %c0_i32_0 = arith.constant 0 : i32
    %c0_i32_1 = arith.constant 0 : i32
    return %c0_i32, %c0_i32_0 : i32, i32
  }
  func.func @transform_5(%arg0: i32) -> (i32, i32) {
    %c0_i32 = arith.constant 0 : i32
    %c0_i32_0 = arith.constant 0 : i32
    %c0_i32_1 = arith.constant 0 : i32
    return %c0_i32, %c0_i32_0 : i32, i32
  }
  func.func @transform_6(%arg0: i32) -> (i32, i32) {
    %c0_i32 = arith.constant 0 : i32
    %c0_i32_0 = arith.constant 0 : i32
    %c0_i32_1 = arith.constant 0 : i32
    return %c0_i32, %c0_i32_0 : i32, i32
  }
  func.func @transform_7(%arg0: i32) -> (i32, i32) {
    %c0_i32 = arith.constant 0 : i32
    %c0_i32_0 = arith.constant 0 : i32
    return %arg0, %c0_i32 : i32, i32
  }
}

</mosaic_0001>

<bundles_post_ra>
// kernel: tpu_custom_call.1
= control target key start
LH: loop header
LB: loop body
LE: loop exit
PB: predicated region body
PF: predicated region fallthrough
CT: control target
= control target key end

     0   :  { %12 = vsyncpa [#allocation3], 0  ;;  %s1281_s0 = inlined_call_operand.hbm [shape: f32[8,8,128], index: 0, kind: input, shape index: {}]   ;;  %s1282_s1 = inlined_call_operand.hbm [shape: f32[8,128], index: 1, kind: input, shape index: {}]   ;;  %s1283_s2 = inlined_call_operand.hbm [shape: f32[8,128], index: 2, kind: input, shape index: {}]   ;;  %s1284_s3 = inlined_call_operand.hbm [shape: bf16[128,128], index: 3, kind: input, shape index: {}]   ;;  %s1285_s4 = inlined_call_operand.hbm [shape: bf16[128,128], index: 4, kind: input, shape index: {}]   ;;  %s1286_s5 = inlined_call_operand.vmem [shape: f32[1,128], index: 5, kind: input, shape index: {}]   ;;  %s1287_s6 = inlined_call_operand.vmem [shape: f32[1,128], index: 6, kind: input, shape index: {}]   ;;  %s1288_s7 = inlined_call_operand.hbm [shape: f32[1,128], index: 7, kind: output, shape index: {}]  }
   0x1   :  { %13 = vsyncpa [#allocation6], 0 }
   0x2   :  { %14 = vsyncpa [#allocation9], 0 }
   0x3   :  { %15 = vsyncpa [#allocation4], 0  ;;  %s1054_s24 = smov [#allocation5]   ;;  %s1055_s26 = smov [#allocation8]  }
   0x4   :  { %s34_s25 = sshll.u32 %s1054_s24, 4  ;;  %s53_s27 = sshll.u32 %s1055_s26, 4  ;;  %s35_s25 = int_to_ptr.vmem [resolvable:$true] %s34_s25  ;;  %s1107_s27 = int_to_ptr.vmem [resolvable:$true] %s53_s27 }
   0x5   :  { %s914_s30 = scalar_lea.hbm %s1282_s1, 128 }
   0x6   :  { %p915_p0 = scmp.ne.s32.totalorder %s1282_s1, %s914_s30  ;;  %p918_p1 = scmp.lt.u32.totalorder %s914_s30, %s1282_s1 }
   0x8   :  { %p920_p2 = pnand %p918_p1, %p915_p0 }
   0xa   :  { %923 = shalt.err (!%p920_p2)
}
   0xb   :  { %s924_s12 = scalar_lea.vmem %s35_s25, 128  ;;  %p929_p4 = scmp.lt.s32.totalorder %s35_s25, %s35_s25 }
   0xc   :  { %p925_p3 = scmp.ne.s32.totalorder %s35_s25, %s924_s12  ;;  %p930_p5 = scmp.lt.s32.totalorder %s924_s12, %s924_s12 }
   0xe   :  { %p931_p6 = por %p930_p5, %p929_p4 }
  0x10   :  { %p932_p7 = pnand %p931_p6, %p925_p3 }
  0x12   :  { %935 = shalt.err (!%p932_p7)
}
  0x13   :  { %37 = dma.hbm_to_vmem [thread:$0]  %s1282_s1, 128, %s35_s25, [#allocation6]  }
  0x14   :  { %s936_s17 = scalar_lea.hbm %s1284_s3, 1024 }
  0x15   :  { %p937_p8 = scmp.ne.s32.totalorder %s1284_s3, %s936_s17  ;;  %p940_p9 = scmp.lt.u32.totalorder %s936_s17, %s1284_s3 }
  0x17   :  { %p942_p10 = pnand %p940_p9, %p937_p8 }
  0x19   :  { %945 = shalt.err (!%p942_p10)
}
  0x1a   :  { %s946_s22 = scalar_lea.vmem %s1107_s27, 1024  ;;  %p951_p12 = scmp.lt.s32.totalorder %s1107_s27, %s1107_s27 }
  0x1b   :  { %p947_p11 = scmp.ne.s32.totalorder %s1107_s27, %s946_s22  ;;  %p952_p13 = scmp.lt.s32.totalorder %s946_s22, %s946_s22 }
  0x1d   :  { %p953_p0 = por %p952_p13, %p951_p12 }
  0x1f   :  { %p954_p1 = pnand %p953_p0, %p947_p11 }
  0x21   :  { %957 = shalt.err (!%p954_p1)
}
  0x22   :  { %s1056_s1 = smov 64   ;;  %s1057_s23 = smov 4  }
  0x23   :  { %59 = dma.hbm_to_vmem [thread:$0]  %s1284_s3, 1024, %s1107_s27, [#allocation9], %s1056_s1, %s1056_s1, %s1057_s23  }
  0x24   :  { %s1058_s26 = smov [#allocation2]   ;;  %s958_s8 = scalar_lea.hbm %s1281_s0, 1024 }
  0x25   :  { %s21_s28 = sshll.u32 %s1058_s26, 4  ;;  %p959_p2 = scmp.ne.s32.totalorder %s1281_s0, %s958_s8  ;;  %s22_s28 = int_to_ptr.vmem [resolvable:$true] %s21_s28 }
  0x26   :  { %p962_p3 = scmp.lt.u32.totalorder %s958_s8, %s1281_s0 }
  0x28   :  { %p964_p4 = pnand %p962_p3, %p959_p2 }
  0x2a   :  { %967 = shalt.err (!%p964_p4)
}
  0x2b   :  { %s968_s13 = scalar_lea.vmem %s22_s28, 1024  ;;  %p973_p6 = scmp.lt.s32.totalorder %s22_s28, %s22_s28 }
  0x2c   :  { %p969_p5 = scmp.ne.s32.totalorder %s22_s28, %s968_s13  ;;  %p974_p7 = scmp.lt.s32.totalorder %s968_s13, %s968_s13 }
  0x2e   :  { %p975_p8 = por %p974_p7, %p973_p6 }
  0x30   :  { %p976_p9 = pnand %p975_p8, %p969_p5 }
  0x32   :  { %979 = shalt.err (!%p976_p9)
}
  0x33   :  { %s1059_s3 = smov 128   ;;  %s1060_s27 = smov 8  }
  0x34   :  { %27 = dma.hbm_to_vmem [thread:$0]  %s1281_s0, 1024, %s22_s28, [#allocation3], %s1059_s3, %s1059_s3, %s1060_s27  }
  0x35   :  { %s1061_s16 = smov [#allocation7]   ;;  %s1062_s18 = smov [#allocation10]  }
  0x36   :  { %s44_s17 = sshll.u32 %s1061_s16, 4  ;;  %s65_s19 = sshll.u32 %s1062_s18, 4  ;;  %s45_s17 = int_to_ptr.vmem [resolvable:$true] %s44_s17  ;;  %s66_s19 = int_to_ptr.vmem [resolvable:$true] %s65_s19 }
  0x37   :  { %s980_s22 = scalar_lea.hbm %s1283_s2, 128 }
  0x38   :  { %p981_p10 = scmp.ne.s32.totalorder %s1283_s2, %s980_s22  ;;  %p984_p11 = scmp.lt.u32.totalorder %s980_s22, %s1283_s2 }
  0x3a   :  { %p986_p12 = pnand %p984_p11, %p981_p10 }
  0x3c   :  { %989 = shalt.err (!%p986_p12)
}
  0x3d   :  { %s990_s0 = scalar_lea.vmem %s45_s17, 128  ;;  %p995_p0 = scmp.lt.s32.totalorder %s45_s17, %s45_s17 }
  0x3e   :  { %p991_p13 = scmp.ne.s32.totalorder %s45_s17, %s990_s0  ;;  %p996_p1 = scmp.lt.s32.totalorder %s990_s0, %s990_s0 }
  0x40   :  { %p997_p2 = por %p996_p1, %p995_p0 }
  0x42   :  { %p998_p3 = pnand %p997_p2, %p991_p13 }
  0x44   :  { %1001 = shalt.err (!%p998_p3)
}
  0x45   :  { %47 = dma.hbm_to_vmem [thread:$0]  %s1283_s2, 128, %s45_s17, [#allocation6]  }
  0x46   :  { %s1002_s10 = scalar_lea.hbm %s1285_s4, 1024 }
  0x47   :  { %p1003_p4 = scmp.ne.s32.totalorder %s1285_s4, %s1002_s10  ;;  %p1006_p5 = scmp.lt.u32.totalorder %s1002_s10, %s1285_s4 }
  0x49   :  { %p1008_p6 = pnand %p1006_p5, %p1003_p4 }
  0x4b   :  { %1011 = shalt.err (!%p1008_p6)
}
  0x4c   :  { %s1012_s27 = scalar_lea.vmem %s66_s19, 1024  ;;  %p1017_p8 = scmp.lt.s32.totalorder %s66_s19, %s66_s19 }
  0x4d   :  { %p1013_p7 = scmp.ne.s32.totalorder %s66_s19, %s1012_s27  ;;  %p1018_p9 = scmp.lt.s32.totalorder %s1012_s27, %s1012_s27 }
  0x4f   :  { %p1019_p10 = por %p1018_p9, %p1017_p8 }
  0x51   :  { %p1020_p11 = pnand %p1019_p10, %p1013_p7 }
  0x53   :  { %1023 = shalt.err (!%p1020_p11)
}
  0x54   :  { %71 = dma.hbm_to_vmem [thread:$0]  %s1285_s4, 1024, %s66_s19, [#allocation9], %s1056_s1, %s1056_s1, %s1057_s23  }
  0x55   :  { %1046 = dma.done.wait [#allocation3], 1024  }
  0x56   :  { %1047 = vsyncadd [#allocation3], 4294966272 }
  0x57   :  { %1048 = dma.done.wait [#allocation6], 256  }
  0x58   :  { %1049 = vsyncadd [#allocation6], 4294967040 }
  0x59   :  { %1050 = dma.done.wait [#allocation9], 2048  }
  0x5a   :  { %1051 = vsyncadd [#allocation9], 4294965248  ;;  %v1063_v0 = vmov 0.0   ;;  %vm1064_vm0 = vmmov 0   ;;  %v866_v1 = vld [vmem:[#allocation8] sm:$0xff]   ;;  %v868_v3 = vld [vmem:[#allocation8 + $0x8] sm:$0xff]   ;;  %v344_v33 = vlaneseq }
  0x5b   :  { %833 = vmatprep.subr.bf16.mxu1 %v1063_v0  ;;  %849 = vmatprep.mubr.msk.bf16.mxu1 %vm1064_vm0, %v1063_v0  ;;  %v867_v2 = vld [vmem:[#allocation10] sm:$0xff]   ;;  %v869_v4 = vld [vmem:[#allocation10 + $0x8] sm:$0xff]   ;;  %v870_v5 = vld [vmem:[#allocation8 + $0x10] sm:$0xff]   ;;  %v1065_v31 = vmov 1966171168   ;;  %vm725_vm1 = vcmask 1041409  }
  0x5c   :  { %809 = vmatprep.subr.bf16.mxu0 %v866_v1  ;;  %834 = vmatpush3.bf16.msra.mxu1 %v867_v2  ;;  %v871_v6 = vld [vmem:[#allocation10 + $0x10] sm:$0xff]   ;;  %v872_v7 = vld [vmem:[#allocation8 + $0x18] sm:$0xff]   ;;  %v874_v9 = vld [vmem:[#allocation8 + $0x20] sm:$0xff]   ;;  %v342_v32 = vunpack.c.l.s4 %v1065_v31  ;;  %v345_v35 = vshrl.u32 %v344_v33, 7  ;;  %vm728_vm2 = vcmask 1042434   ;;  %vm731_vm3 = vcmask 1043459  }
  0x5d   :  { %810 = vmatpush3.bf16.msra.mxu0 %v866_v1  ;;  %835 = vmatprep.subr.bf16.mxu1 %v1063_v0  ;;  %v873_v8 = vld [vmem:[#allocation10 + $0x18] sm:$0xff]   ;;  %v875_v10 = vld [vmem:[#allocation10 + $0x20] sm:$0xff]   ;;  %v876_v11 = vld [vmem:[#allocation8 + $0x28] sm:$0xff]   ;;  %vm734_vm4 = vcmask 1044484   ;;  %vm737_vm5 = vcmask 1045509   ;;  %vm740_vm6 = vcmask 1046534  }
  0x5e   :  { %811 = vmatprep.subr.bf16.mxu0 %v868_v3  ;;  %v1180_v12 = vld [vmem:[#allocation2] sm:$0xff]  ;;  %v1182_v13 = vld [vmem:[#allocation2 + $0x8] sm:$0xff]  ;;  %v877_v15 = vld [vmem:[#allocation10 + $0x28] sm:$0xff]   ;;  %v343_v34 = vunpack.c.0.s8 %v342_v32  ;;  %v391_v43 = vsub.s32 0, %v345_v35  ;;  %vm743_vm7 = vcmask 1047559  }
  0x5f   :  { %v100_v14 = vpack.c.bf16 %v1182_v13, %v1180_v12  ;;  %v878_v16 = vld [vmem:[#allocation8 + $0x30] sm:$0xff]   ;;  %v880_v18 = vld [vmem:[#allocation8 + $0x38] sm:$0xff]   ;;  %v1186_v21 = vld [vmem:[#allocation2 + $0x10] sm:$0xff] }
  0x60   :  { %836 = vmatpush3.bf16.msra.mxu1 %v869_v4  ;;  %v879_v17 = vld [vmem:[#allocation10 + $0x30] sm:$0xff]   ;;  %v881_v19 = vld [vmem:[#allocation10 + $0x38] sm:$0xff]   ;;  %v1188_v22 = vld [vmem:[#allocation2 + $0x18] sm:$0xff]  ;;  %v346_v36 = vsub.s32 %v343_v34, %v345_v35 }
  0x61   :  { %812 = vmatpush3.bf16.msra.mxu0 %v868_v3  ;;  %837 = vmatprep.subr.bf16.mxu1 %v1063_v0  ;;  %v233_v20 = vld [vmem:[#allocation5] sm:$0xff]  ;;  %v1192_v24 = vld [vmem:[#allocation2 + $0x28] sm:$0xff]  ;;  %v101_v26 = vpack.c.bf16 %v1188_v22, %v1186_v21  ;;  %v1198_v28 = vld [vmem:[#allocation2 + $0x30] sm:$0xff] }
  0x62   :  { %813 = vmatprep.subr.bf16.mxu0 %v870_v5  ;;  %825 = vmatprep.mubr.bf16.mxu0 %v100_v14  ;;  %v1190_v23 = vld [vmem:[#allocation2 + $0x20] sm:$0xff]  ;;  %v234_v25 = vpack.c.bf16 %v233_v20, %v233_v20  ;;  %v1200_v29 = vld [vmem:[#allocation2 + $0x38] sm:$0xff] }
  0x63   :  { %v102_v27 = vpack.c.bf16 %v1192_v24, %v1190_v23  ;;  %v103_v30 = vpack.c.bf16 %v1200_v29, %v1198_v28  ;;  %v786_v57 = vld [vmem:[%s1286_s5] ss:$0 sm:$0xff] }
  0x64   :  { %838 = vmatpush3.bf16.msra.mxu1 %v871_v6 }
  0x65   :  { %814 = vmatpush3.bf16.msra.mxu0 %v870_v5  ;;  %839 = vmatprep.subr.bf16.mxu1 %v1063_v0 }
  0x66   :  { %815 = vmatprep.subr.bf16.mxu0 %v872_v7 }
  0x68   :  { %840 = vmatpush3.bf16.msra.mxu1 %v873_v8 }
  0x69   :  { %816 = vmatpush3.bf16.msra.mxu0 %v872_v7  ;;  %841 = vmatprep.subr.bf16.mxu1 %v1063_v0 }
  0x6a   :  { %817 = vmatprep.subr.bf16.mxu0 %v874_v9 }
  0x6c   :  { %842 = vmatpush3.bf16.msra.mxu1 %v875_v10 }
  0x6d   :  { %818 = vmatpush3.bf16.msra.mxu0 %v874_v9  ;;  %843 = vmatprep.subr.bf16.mxu1 %v1063_v0 }
  0x6e   :  { %819 = vmatprep.subr.bf16.mxu0 %v876_v11 }
  0x70   :  { %844 = vmatpush3.bf16.msra.mxu1 %v877_v15 }
  0x71   :  { %820 = vmatpush3.bf16.msra.mxu0 %v876_v11  ;;  %845 = vmatprep.subr.bf16.mxu1 %v1063_v0 }
  0x72   :  { %821 = vmatprep.subr.bf16.mxu0 %v878_v16 }
  0x74   :  { %846 = vmatpush3.bf16.msra.mxu1 %v879_v17  ;;  %v787_v17 = vld [vmem:[%s1287_s6] ss:$0 sm:$0xff]  ;;  %s1066_s6 = smov [#allocation11]  }
  0x75   :  { %822 = vmatpush3.bf16.msra.mxu0 %v878_v16  ;;  %847 = vmatprep.subr.bf16.mxu1 %v1063_v0  ;;  %s759_s15 = sshll.u32 %s1066_s6, 4  ;;  %s760_s15 = int_to_ptr.vmem [resolvable:$true] %s759_s15 }
  0x76   :  { %823 = vmatprep.subr.bf16.mxu0 %v880_v18  ;;  %s1024_s16 = scalar_lea.vmem %s760_s15, 16  ;;  %s1028_s17 = scalar_lea.vmem %s760_s15, 32 }
  0x77   :  { %p1025_p12 = scmp.ne.s32.totalorder %s760_s15, %s1024_s16  ;;  %p1029_p13 = scmp.lt.s32.totalorder %s760_s15, %s760_s15 }
  0x78   :  { %848 = vmatpush3.bf16.msra.mxu1 %v881_v19  ;;  %p1030_p0 = scmp.lt.s32.totalorder %s1028_s17, %s1024_s16 }
  0x79   :  { %824 = vmatpush3.bf16.msra.mxu0 %v880_v18 }
  0x7a   :  { %p1031_p1 = por %p1030_p0, %p1029_p13 }
  0x7b   :  { %850 = vmatmul.mubr.bf16.vlgmr.msra.gmra.mrb[0].mxu1 %v234_v25 }
  0x7c   :  { %826 = vmatmul.mubr.bf16.vlgmr.msra.gmra.mrb[0].mxu0 %v101_v26  ;;  %p1032_p2 = pnand %p1031_p1, %p1025_p12 }
  0x7d   :  { %829 = vmatprep.mubr.bf16.mxu0 %v102_v27 }
  0x84   :  { %830 = vmatmul.mubr.bf16.gmra.mrb[4].mxu0 %v103_v30 }
 0x14e   :  { %v333_v37 = vpop.f32.mrb[0].mxu1 }
 0x14f   :  { %v827_v38 = vpop.f32.mrb[0].mxu0  ;;  %v340_v39 = vcombine.high %v333_v37, %v333_v37  ;;  %v347_v40 = vrot.slane %v333_v37, %v346_v36  ;;  %v851_v41 = vpop.f32.mrb[1].mxu1 }
 0x150   :  { %v202_v42 = vpop.f32.mrb[1].mxu0  ;;  %v336_v44 = vpop.f32.mrb[2].mxu1 }
 0x151   :  { %v828_v45 = vpop.f32.mrb[2].mxu0  ;;  %v354_v46 = vrot.slane %v340_v39, %v346_v36  ;;  %v355_v47 = vcombine.high %v347_v40, %v347_v40  ;;  %v363_v48 = vrot.slane %v347_v40, %v346_v36  ;;  %v852_v49 = vpop.f32.mrb[3].mxu1 }
 0x152   :  { %v205_v50 = vpop.f32.mrb[3].mxu0 }
 0x153   :  { %v356_v51 = vcombine.high %v354_v46, %v354_v46  ;;  %v370_v52 = vrot.slane %v354_v46, %v346_v36  ;;  %v377_v53 = vrot.slane %v355_v47, %v346_v36  ;;  %v385_v54 = vcombine.high %v363_v48, %v363_v48 }
 0x154   :  { %v392_v55 = vrot.slane %v363_v48, %v391_v43 }
 0x155   :  { %v400_v56 = vrot.slane %v385_v54, %v391_v43  ;;  %v387_v58 = vcombine.high %v377_v53, %v377_v53  ;;  %v396_v59 = vrot.slane %v377_v53, %v391_v43  ;;  %v386_v60 = vcombine.high %v370_v52, %v370_v52 }
 0x156   :  { %v429_v61 = vadd.f32 %v392_v55, %v202_v42  ;;  %v408_v63 = vrot.slane %v370_v52, %v391_v43  ;;  %v384_v0 = vrot.slane %v356_v51, %v346_v36 }
 0x157   :  { %v831_v62 = vpop.f32.mrb[4].mxu0  ;;  %v431_v1 = vadd.f32 %v827_v38, %v400_v56  ;;  %v404_v2 = vrot.slane %v387_v58, %v391_v43  ;;  %v430_v3 = vadd.f32 %v396_v59, %v205_v50  ;;  %v416_v4 = vrot.slane %v386_v60, %v391_v43 }
 0x158   :  { %v218_v5 = vpop.f32.mrb[5].mxu0  ;;  %v388_v8 = vcombine.high %v384_v0, %v384_v0  ;;  %v412_v9 = vrot.slane %v384_v0, %v391_v43  ;;  %v444_v10 = vadd.f32 %v786_v57, %v429_v61 }
 0x159   :  { %v433_v6 = vadd.f32 %v408_v63, %v218_v5  ;;  %v832_v7 = vpop.f32.mrb[6].mxu0  ;;  %v446_v11 = vadd.f32 %v786_v57, %v431_v1  ;;  %v432_v14 = vadd.f32 %v828_v45, %v404_v2  ;;  %v435_v15 = vadd.f32 %v831_v62, %v416_v4 }
 0x15a   :  { %v221_v16 = vpop.f32.mrb[7].mxu0  ;;  %v445_v18 = vadd.f32 %v786_v57, %v430_v3  ;;  %v420_v19 = vrot.slane %v388_v8, %v391_v43  ;;  %v452_v25 = vmax.f32 %v444_v10, 0.0 }
 0x15b   :  { %v434_v20 = vadd.f32 %v412_v9, %v221_v16  ;;  %v447_v26 = vadd.f32 %v786_v57, %v432_v14  ;;  %v454_v33 = vmax.f32 %v446_v11, 0.0  ;;  %v448_v35 = vadd.f32 %v786_v57, %v433_v6 }
 0x15c   :  { %v453_v27 = vmax.f32 %v445_v18, 0.0  ;;  %v436_v30 = vadd.f32 %v832_v7, %v420_v19  ;;  %v467_v32 = vmul.f32 %v787_v17, %v452_v25  ;;  %v450_v40 = vadd.f32 %v786_v57, %v435_v15 }
 0x15d   :  { %v449_v31 = vadd.f32 %v786_v57, %v434_v20  ;;  %v455_v34 = vmax.f32 %v447_v26, 0.0  ;;  %v456_v41 = vmax.f32 %v448_v35, 0.0  ;;  %v469_v42 = vmul.f32 %v787_v17, %v454_v33 }
 0x15e   :  { %v468_v36 = vmul.f32 %v787_v17, %v453_v27  ;;  %475 = vadd.xlane.f32.xlu1 %v467_v32  ;;  %v451_v38 = vadd.f32 %v786_v57, %v436_v30  ;;  %v458_v45 = vmax.f32 %v450_v40, 0.0 }
 0x15f   :  { %v470_v37 = vmul.f32 %v787_v17, %v455_v34  ;;  %v457_v39 = vmax.f32 %v449_v31, 0.0  ;;  %v471_v46 = vmul.f32 %v787_v17, %v456_v41 }
 0x160   :  { %477 = vadd.xlane.f32.xlu0 %v468_v36  ;;  %v459_v43 = vmax.f32 %v451_v38, 0.0  ;;  %v473_v48 = vmul.f32 %v787_v17, %v458_v45 }
 0x161   :  { %v472_v44 = vmul.f32 %v787_v17, %v457_v39 }
 0x162   :  { %481 = vadd.xlane.f32.xlu1 %v470_v37  ;;  %v474_v47 = vmul.f32 %v787_v17, %v459_v43 }
 0x164   :  { %479 = vadd.xlane.f32.xlu0 %v469_v42 }
 0x166   :  { %485 = vadd.xlane.f32.xlu1 %v472_v44 }
 0x168   :  { %483 = vadd.xlane.f32.xlu0 %v471_v46 }
 0x16a   :  { %489 = vadd.xlane.f32.xlu1 %v474_v47 }
 0x16c   :  { %487 = vadd.xlane.f32.xlu0 %v473_v48 }
 0x1eb   :  { %v476_v49 = vpop.xlane.xlu1 %475 }
 0x1ec   :  { %v491_v50 = vrot.slane %v476_v49, 4 }
 0x1ed   :  { %v478_v51 = vpop.xlane.xlu0 %477 }
 0x1ee   :  { %v497_v52 = vrot.slane %v478_v51, 4  ;;  %v492_v53 = vmax.f32 %v476_v49, %v491_v50 }
 0x1ef   :  { %v482_v55 = vpop.xlane.xlu1 %481 }
 0x1f0   :  { %v498_v54 = vmax.f32 %v478_v51, %v497_v52  ;;  %v493_v56 = vrot.slane %v492_v53, 2  ;;  %v509_v57 = vrot.slane %v482_v55, 4 }
 0x1f1   :  { %v480_v58 = vpop.xlane.xlu0 %479 }
 0x1f2   :  { %v499_v59 = vrot.slane %v498_v54, 2  ;;  %v503_v60 = vrot.slane %v480_v58, 4  ;;  %v494_v61 = vmax.f32 %v492_v53, %v493_v56  ;;  %v510_v62 = vmax.f32 %v482_v55, %v509_v57 }
 0x1f3   :  { %v486_v1 = vpop.xlane.xlu1 %485 }
 0x1f4   :  { %v500_v63 = vmax.f32 %v498_v54, %v499_v59  ;;  %v504_v0 = vmax.f32 %v480_v58, %v503_v60  ;;  %v495_v2 = vrot.slane %v494_v61, 1  ;;  %v511_v3 = vrot.slane %v510_v62, 2 }
 0x1f5   :  { %v521_v4 = vrot.slane %v486_v1, 4  ;;  %v484_v5 = vpop.xlane.xlu0 %483 }
 0x1f6   :  { %v501_v6 = vrot.slane %v500_v63, 1  ;;  %v505_v7 = vrot.slane %v504_v0, 2  ;;  %v515_v8 = vrot.slane %v484_v5, 4  ;;  %v496_v9 = vmax.f32 %v494_v61, %v495_v2 }
 0x1f7   :  { %v512_v10 = vmax.f32 %v510_v62, %v511_v3  ;;  %v522_v11 = vmax.f32 %v486_v1, %v521_v4  ;;  %v490_v17 = vpop.xlane.xlu1 %489 }
 0x1f8   :  { %v502_v14 = vmax.f32 %v500_v63, %v501_v6  ;;  %v506_v15 = vmax.f32 %v504_v0, %v505_v7  ;;  %v516_v16 = vmax.f32 %v484_v5, %v515_v8  ;;  %v539_v18 = vsub.f32 %v476_v49, %v496_v9 }
 0x1f9   :  { %v513_v19 = vrot.slane %v512_v10, 1  ;;  %v523_v20 = vrot.slane %v522_v11, 2  ;;  %v533_v25 = vrot.slane %v490_v17, 4  ;;  %v488_v26 = vpop.xlane.xlu0 %487 }
 0x1fa   :  { %v540_v27 = vsub.f32 %v478_v51, %v502_v14  ;;  %v507_v30 = vrot.slane %v506_v15, 1  ;;  %v517_v31 = vrot.slane %v516_v16, 2  ;;  %v527_v32 = vrot.slane %v488_v26, 4 }
 0x1fb   :  { %v547_v33 = vmul.f32 1.442695, %v539_v18  ;;  %v514_v34 = vmax.f32 %v512_v10, %v513_v19  ;;  %v524_v35 = vmax.f32 %v522_v11, %v523_v20  ;;  %v534_v36 = vmax.f32 %v490_v17, %v533_v25 }
 0x1fc   :  { %v549_v37 = vmul.f32 1.442695, %v540_v27  ;;  %v508_v38 = vmax.f32 %v506_v15, %v507_v30  ;;  %v518_v39 = vmax.f32 %v516_v16, %v517_v31  ;;  %v528_v40 = vmax.f32 %v488_v26, %v527_v32 }
 0x1fd   :  { %882 = vpow2.f32 %v547_v33  ;;  %v542_v41 = vsub.f32 %v482_v55, %v514_v34  ;;  %v525_v42 = vrot.slane %v524_v35, 1  ;;  %v535_v43 = vrot.slane %v534_v36, 2 }
 0x1fe   :  { %884 = vpow2.f32 %v549_v37  ;;  %v541_v44 = vsub.f32 %v480_v58, %v508_v38  ;;  %v519_v45 = vrot.slane %v518_v39, 1  ;;  %v529_v46 = vrot.slane %v528_v40, 2 }
 0x1ff   :  { %v553_v47 = vmul.f32 1.442695, %v542_v41  ;;  %v526_v48 = vmax.f32 %v524_v35, %v525_v42  ;;  %v536_v49 = vmax.f32 %v534_v36, %v535_v43 }
 0x200   :  { %v551_v50 = vmul.f32 1.442695, %v541_v44  ;;  %v520_v51 = vmax.f32 %v518_v39, %v519_v45  ;;  %v530_v52 = vmax.f32 %v528_v40, %v529_v46 }
 0x201   :  { %886 = vpow2.f32 %v553_v47  ;;  %v544_v53 = vsub.f32 %v486_v1, %v526_v48  ;;  %v537_v54 = vrot.slane %v536_v49, 1 }
 0x202   :  { %888 = vpow2.f32 %v551_v50  ;;  %v543_v56 = vsub.f32 %v484_v5, %v520_v51  ;;  %v531_v57 = vrot.slane %v530_v52, 1 }
 0x203   :  { %v557_v59 = vmul.f32 1.442695, %v544_v53  ;;  %v538_v55 = vmax.f32 %v536_v49, %v537_v54 }
 0x204   :  { %v555_v60 = vmul.f32 1.442695, %v543_v56  ;;  %v532_v61 = vmax.f32 %v530_v52, %v531_v57 }
 0x205   :  { %890 = vpow2.f32 %v557_v59  ;;  %v546_v58 = vsub.f32 %v490_v17, %v538_v55 }
 0x206   :  { %892 = vpow2.f32 %v555_v60  ;;  %v545_v62 = vsub.f32 %v488_v26, %v532_v61 }
 0x207   :  { %v1210_v63 = vpop.eup %882  ;;  %v561_v0 = vmul.f32 1.442695, %v546_v58 }
 0x208   :  { %v1212_v2 = vpop.eup %884  ;;  %v563_v3 = vrot.slane %v1210_v63, 4  ;;  %v559_v1 = vmul.f32 1.442695, %v545_v62 }
 0x209   :  { %v569_v4 = vrot.slane %v1212_v2, 4  ;;  %894 = vpow2.f32 %v561_v0 }
 0x20a   :  { %v564_v5 = vadd.f32 %v1210_v63, %v563_v3  ;;  %896 = vpow2.f32 %v559_v1 }
 0x20b   :  { %v1217_v6 = vpop.eup %886  ;;  %v570_v7 = vadd.f32 %v1212_v2, %v569_v4 }
 0x20c   :  { %v1220_v8 = vpop.eup %888  ;;  %v565_v9 = vrot.slane %v564_v5, 2  ;;  %v581_v10 = vrot.slane %v1217_v6, 4 }
 0x20d   :  { %v571_v11 = vrot.slane %v570_v7, 2  ;;  %v575_v14 = vrot.slane %v1220_v8, 4 }
 0x20e   :  { %v566_v15 = vadd.f32 %v565_v9, %v564_v5  ;;  %v582_v16 = vadd.f32 %v1217_v6, %v581_v10 }
 0x20f   :  { %v1225_v17 = vpop.eup %890  ;;  %v572_v18 = vadd.f32 %v571_v11, %v570_v7  ;;  %v576_v19 = vadd.f32 %v1220_v8, %v575_v14 }
 0x210   :  { %v1228_v20 = vpop.eup %892  ;;  %v567_v25 = vrot.slane %v566_v15, 1  ;;  %v583_v26 = vrot.slane %v582_v16, 2  ;;  %v593_v27 = vrot.slane %v1225_v17, 4 }
 0x211   :  { %v573_v30 = vrot.slane %v572_v18, 1  ;;  %v577_v31 = vrot.slane %v576_v19, 2  ;;  %v587_v32 = vrot.slane %v1228_v20, 4 }
 0x212   :  { %v568_v33 = vadd.f32 %v567_v25, %v566_v15  ;;  %v584_v34 = vadd.f32 %v583_v26, %v582_v16  ;;  %v594_v35 = vadd.f32 %v1225_v17, %v593_v27  ;;  %v1249_v26 = vld [vmem:[#allocation7] sm:$0xff] }
 0x213   :  { %v1233_v36 = vpop.eup %894  ;;  %v574_v37 = vadd.f32 %v573_v30, %v572_v18  ;;  %v578_v38 = vadd.f32 %v577_v31, %v576_v19  ;;  %v588_v39 = vadd.f32 %v1228_v20, %v587_v32 }
 0x214   :  { %v1236_v40 = vpop.eup %896  ;;  %898 = vrcp.f32 %v568_v33  ;;  %v585_v41 = vrot.slane %v584_v34, 1  ;;  %v595_v42 = vrot.slane %v594_v35, 2  ;;  %v605_v43 = vrot.slane %v1233_v36, 4 }
 0x215   :  { %900 = vrcp.f32 %v574_v37  ;;  %v579_v44 = vrot.slane %v578_v38, 1  ;;  %v589_v45 = vrot.slane %v588_v39, 2  ;;  %v599_v46 = vrot.slane %v1236_v40, 4 }
 0x216   :  { %v586_v47 = vadd.f32 %v585_v41, %v584_v34  ;;  %v596_v48 = vadd.f32 %v595_v42, %v594_v35  ;;  %v606_v49 = vadd.f32 %v1233_v36, %v605_v43 }
 0x217   :  { %v580_v50 = vadd.f32 %v579_v44, %v578_v38  ;;  %v590_v51 = vadd.f32 %v589_v45, %v588_v39  ;;  %v600_v52 = vadd.f32 %v1236_v40, %v599_v46  ;;  %v687_v38 = vrot.slane %v1249_v26, 3 }
 0x218   :  { %902 = vrcp.f32 %v586_v47  ;;  %v597_v53 = vrot.slane %v596_v48, 1  ;;  %v607_v54 = vrot.slane %v606_v49, 2 }
 0x219   :  { %904 = vrcp.f32 %v580_v50  ;;  %v591_v56 = vrot.slane %v590_v51, 1  ;;  %v601_v57 = vrot.slane %v600_v52, 2 }
 0x21a   :  { %v598_v59 = vadd.f32 %v597_v53, %v596_v48  ;;  %v608_v55 = vadd.f32 %v607_v54, %v606_v49 }
 0x21b   :  { %v592_v60 = vadd.f32 %v591_v56, %v590_v51  ;;  %v602_v61 = vadd.f32 %v601_v57, %v600_v52 }
 0x21c   :  { %906 = vrcp.f32 %v598_v59  ;;  %v609_v58 = vrot.slane %v608_v55, 1 }
 0x21d   :  { %908 = vrcp.f32 %v592_v60  ;;  %v603_v62 = vrot.slane %v602_v61, 1 }
 0x21e   :  { %v899_v0 = vpop.eup %898  ;;  %v610_v3 = vadd.f32 %v609_v58, %v608_v55 }
 0x21f   :  { %v901_v1 = vpop.eup %900  ;;  %v619_v4 = vmul.f32 %v899_v0, %v1210_v63  ;;  %v604_v5 = vadd.f32 %v603_v62, %v602_v61 }
 0x220   :  { %v620_v7 = vmul.f32 %v901_v1, %v1212_v2  ;;  %910 = vrcp.f32 %v610_v3 }
 0x221   :  { %v627_v9 = vmul.f32 %v619_v4, %v1180_v12  ;;  %912 = vrcp.f32 %v604_v5 }
 0x222   :  { %v903_v10 = vpop.eup %902  ;;  %v628_v11 = vmul.f32 %v620_v7, %v1182_v13 }
 0x223   :  { %v905_v14 = vpop.eup %904  ;;  %v635_v15 = vrot.slane %v627_v9, 4  ;;  %v622_v16 = vmul.f32 %v903_v10, %v1217_v6 }
 0x224   :  { %v641_v18 = vrot.slane %v628_v11, 4  ;;  %v621_v19 = vmul.f32 %v905_v14, %v1220_v8  ;;  %v685_v8 = vrot.slane %v1249_v26, 1 }
 0x225   :  { %v630_v25 = vmul.f32 %v622_v16, %v1188_v22  ;;  %v636_v63 = vadd.f32 %v635_v15, %v627_v9  ;;  %v688_v16 = vrot.slane %v1249_v26, 4 }
 0x226   :  { %v907_v2 = vpop.eup %906  ;;  %v642_v27 = vadd.f32 %v641_v18, %v628_v11  ;;  %v629_v12 = vmul.f32 %v621_v19, %v1186_v21 }
 0x227   :  { %v909_v30 = vpop.eup %908  ;;  %v624_v31 = vmul.f32 %v907_v2, %v1225_v17  ;;  %v637_v13 = vrot.slane %v636_v63, 2  ;;  %v653_v32 = vrot.slane %v630_v25, 4  ;;  %v686_v17 = vrot.slane %v1249_v26, 2 }
 0x228   :  { %v647_v33 = vrot.slane %v629_v12, 4  ;;  %v623_v6 = vmul.f32 %v909_v30, %v1228_v20  ;;  %v643_v34 = vrot.slane %v642_v27, 2 }
 0x229   :  { %v632_v22 = vmul.f32 %v624_v31, %v1192_v24  ;;  %v638_v35 = vadd.f32 %v637_v13, %v636_v63  ;;  %v654_v37 = vadd.f32 %v653_v32, %v630_v25  ;;  %v691_v63 = vrot.slane %v1249_v26, 7 }
 0x22a   :  { %v911_v39 = vpop.eup %910  ;;  %v631_v21 = vmul.f32 %v623_v6, %v1190_v23  ;;  %v644_v41 = vadd.f32 %v643_v34, %v642_v27  ;;  %v648_v42 = vadd.f32 %v647_v33, %v629_v12  ;;  %v689_v23 = vrot.slane %v1249_v26, 5 }
 0x22b   :  { %v913_v43 = vpop.eup %912  ;;  %v626_v44 = vmul.f32 %v911_v39, %v1233_v36  ;;  %v639_v20 = vrot.slane %v638_v35, 1  ;;  %v655_v45 = vrot.slane %v654_v37, 2  ;;  %v665_v46 = vrot.slane %v632_v22, 4 }
 0x22c   :  { %v625_v47 = vmul.f32 %v913_v43, %v1236_v40  ;;  %v645_v24 = vrot.slane %v644_v41, 1  ;;  %v649_v48 = vrot.slane %v648_v42, 2  ;;  %v659_v49 = vrot.slane %v631_v21, 4 }
 0x22d   :  { %v634_v50 = vmul.f32 %v626_v44, %v1200_v29  ;;  %v656_v51 = vadd.f32 %v655_v45, %v654_v37  ;;  %v666_v52 = vadd.f32 %v665_v46, %v632_v22  ;;  %v640_v36 = vadd.f32 %v639_v20, %v638_v35 }
 0x22e   :  { %v633_v53 = vmul.f32 %v625_v47, %v1198_v28  ;;  %v646_v54 = vadd.f32 %v645_v24, %v644_v41  ;;  %v650_v56 = vadd.f32 %v649_v48, %v648_v42  ;;  %v660_v57 = vadd.f32 %v659_v49, %v631_v21 }
 0x22f   :  { %v657_v59 = vrot.slane %v656_v51, 1  ;;  %v667_v55 = vrot.slane %v666_v52, 2  ;;  %v677_v60 = vrot.slane %v634_v50, 4  ;;  %v700_v10 = vsub.f32 %v640_v36, %v1249_v26 }
 0x230   :  { %v651_v61 = vrot.slane %v650_v56, 1  ;;  %v661_v40 = vrot.slane %v660_v57, 2  ;;  %v671_v58 = vrot.slane %v633_v53, 4  ;;  %v701_v62 = vsub.f32 %v646_v54, %v685_v8 }
 0x231   :  { %v658_v0 = vadd.f32 %v657_v59, %v656_v51  ;;  %v668_v3 = vadd.f32 %v667_v55, %v666_v52  ;;  %v678_v29 = vadd.f32 %v677_v60, %v634_v50  ;;  %v708_v32 = vmul.f32 %v700_v10, %v700_v10 }
 0x232   :  { %v652_v1 = vadd.f32 %v651_v61, %v650_v56  ;;  %v662_v4 = vadd.f32 %v661_v40, %v660_v57  ;;  %v672_v5 = vadd.f32 %v671_v58, %v633_v53  ;;  %v709_v7 = vmul.f32 %v701_v62, %v701_v62 }
 0x233   :  { %v669_v28 = vrot.slane %v668_v3, 1  ;;  %v679_v9 = vrot.slane %v678_v29, 2  ;;  %v703_v11 = vsub.f32 %v658_v0, %v687_v38  ;;  %v690_v34 = vrot.slane %v1249_v26, 6 }
 0x234   :  { %v663_v14 = vrot.slane %v662_v4, 1  ;;  %v673_v15 = vrot.slane %v672_v5, 2  ;;  %v702_v18 = vsub.f32 %v652_v1, %v686_v17  ;;  %v724_v2 = vrot.slane %v709_v7, 7 }
 0x235   :  { %v670_v19 = vadd.f32 %v669_v28, %v668_v3  ;;  %v680_v25 = vadd.f32 %v679_v9, %v678_v29  ;;  %v711_v33 = vmul.f32 %v703_v11, %v703_v11 }
 0x236   :  { %v664_v27 = vadd.f32 %v663_v14, %v662_v4  ;;  %v674_v12 = vadd.f32 %v673_v15, %v672_v5  ;;  %v710_v30 = vmul.f32 %v702_v18, %v702_v18  ;;  %v726_v37 = vsel %vm725_vm1, %v724_v2, %v708_v32 }
 0x237   :  { %v681_v31 = vrot.slane %v680_v25, 1  ;;  %v705_v13 = vsub.f32 %v670_v19, %v689_v23  ;;  %v730_v17 = vrot.slane %v711_v33, 5 }
 0x238   :  { %v675_v6 = vrot.slane %v674_v12, 1  ;;  %v704_v8 = vsub.f32 %v664_v27, %v688_v16  ;;  %v727_v22 = vrot.slane %v710_v30, 6 }
 0x239   :  { %v682_v35 = vadd.f32 %v681_v31, %v680_v25  ;;  %v713_v42 = vmul.f32 %v705_v13, %v705_v13 }
 0x23a   :  { %v676_v38 = vadd.f32 %v675_v6, %v674_v12  ;;  %v712_v39 = vmul.f32 %v704_v8, %v704_v8  ;;  %v729_v21 = vsel %vm728_vm2, %v727_v22, %v726_v37 }
 0x23b   :  { %v707_v41 = vsub.f32 %v682_v35, %v691_v63  ;;  %v732_v45 = vsel %vm731_vm3, %v730_v17, %v729_v21  ;;  %v736_v26 = vrot.slane %v713_v42, 3 }
 0x23c   :  { %v706_v43 = vsub.f32 %v676_v38, %v690_v34  ;;  %v733_v44 = vrot.slane %v712_v39, 4 }
 0x23d   :  { %v715_v20 = vmul.f32 %v707_v41, %v707_v41 }
 0x23e   :  { %v714_v46 = vmul.f32 %v706_v43, %v706_v43  ;;  %v735_v47 = vsel %vm734_vm4, %v733_v44, %v732_v45 }
 0x23f   :  { %v738_v48 = vsel %vm737_vm5, %v736_v26, %v735_v47  ;;  %v742_v49 = vrot.slane %v715_v20, 1 }
 0x240   :  { %v739_v24 = vrot.slane %v714_v46, 2 }
 0x242   :  { %v741_v50 = vsel %vm740_vm6, %v739_v24, %v738_v48 }
 0x243   :  { %v744_v51 = vsel %vm743_vm7, %v742_v49, %v741_v50 }
 0x244   :  { %v746_v52 = vrot.slane %v744_v51, 4 }
 0x246   :  { %v747_v23 = vadd.f32 %v746_v52, %v744_v51 }
 0x248   :  { %v748_v53 = vrot.slane %v747_v23, 2 }
 0x24a   :  { %v749_v54 = vadd.f32 %v748_v53, %v747_v23 }
 0x24c   :  { %v750_v56 = vrot.slane %v749_v54, 1 }
 0x24e   :  { %v751_v57 = vadd.f32 %v750_v56, %v749_v54 }
 0x250   :  { %752 = vst [vmem:[#allocation11] sm:$0x1] %v751_v57 }
 0x251   :  { %1035 = shalt.err (!%p1032_p2)
}
 0x252   :  { %s1036_s20 = scalar_lea.hbm %s1288_s7, 16 }
 0x253   :  { %p1037_p3 = scmp.ne.s32.totalorder %s1288_s7, %s1036_s20  ;;  %p1040_p4 = scmp.lt.u32.totalorder %s1036_s20, %s1288_s7 }
 0x255   :  { %p1042_p5 = pnand %p1040_p4, %p1037_p3 }
 0x257   :  { %1045 = shalt.err (!%p1042_p5)
}
 0x258   :  { %762 = dma.vmem_to_hbm [thread:$0]  %s760_s15, 16, %s1288_s7, [#allocation4]  }
 0x259   :  { %1052 = dma.done.wait [#allocation4], 16  }
 0x25a   :  { %1053 = vsyncadd [#allocation4], 4294967280 }
 0x25b   :  { %766 = vsyncpa [#allocation3], 1 }
 0x25c   :  { %767 = vsyncpa [#allocation6], 1 }
 0x25d   :  { %768 = vsyncpa [#allocation9], 1 }
 0x25e   :  { %769 = vsyncpa [#allocation4], 1 }

</bundles_post_ra>
